<compile_context>
chip_gen: v7x
topology: tpu7x:2x2x1
jax: 0.10.0
libtpu: 0.0.40
codegen_flags: <defaults>
</compile_context>

<pallas_src>
import functools
import numpy as np
import jax
import jax.numpy as jnp
from jax import lax
from jax.experimental import pallas as pl
from jax.experimental.pallas import tpu as pltpu

EPS = 1e-5  # PyTorch BatchNorm default eps


def _pick_tm(M, cap=256):
    """Largest M-tile <= cap that divides M (multiple of 8), else full M."""
    if M <= cap:
        return M
    for tm in range(cap, 0, -8):
        if M % tm == 0:
            return tm
    return M


# ----------------------------------------------------------------------------
# Kernel 1: out = act(scale * (A @ W) + shift).
# Grid (M tiles, K tiles); accumulate directly into the resident output block.
# ----------------------------------------------------------------------------
def _mm_epilogue_kernel(a_ref, w_ref, scale_ref, shift_ref, o_ref, *, act):
    k = pl.program_id(1)

    @pl.when(k == 0)
    def _():
        o_ref[...] = jnp.zeros_like(o_ref)

    o_ref[...] += jnp.dot(a_ref[...], w_ref[...],
                          preferred_element_type=jnp.float32)

    @pl.when(k == pl.num_programs(1) - 1)
    def _():
        y = o_ref[...] * scale_ref[...] + shift_ref[...]
        if act == "leaky":
            y = jnp.where(y >= 0.0, y, 0.2 * y)
        elif act == "sigmoid":
            y = pl.reciprocal(1.0 + jnp.exp(-y), approx=True)
        o_ref[...] = y.astype(o_ref.dtype)


def matmul_epilogue(a, w, scale, shift, act, tk=None, tm_cap=256):
    """a: (M, K), w: (K, N), scale/shift: (N,) -> f32 (M, N)."""
    M, K = a.shape
    K2, N = w.shape
    assert K == K2
    if tk is None:
        tk = K
    assert K % tk == 0
    nk = K // tk
    tm = _pick_tm(M, tm_cap)
    nm = M // tm
    scale2 = scale.reshape(1, N).astype(jnp.float32)
    shift2 = shift.reshape(1, N).astype(jnp.float32)
    kernel = functools.partial(_mm_epilogue_kernel, act=act)
    return pl.pallas_call(
        kernel,
        out_shape=jax.ShapeDtypeStruct((M, N), jnp.float32),
        grid_spec=pltpu.PrefetchScalarGridSpec(
            num_scalar_prefetch=0,
            grid=(nm, nk),
            in_specs=[
                pl.BlockSpec((tm, tk), lambda m, k: (m, k)),
                pl.BlockSpec((tk, N), lambda m, k: (k, 0)),
                pl.BlockSpec((1, N), lambda m, k: (0, 0)),
                pl.BlockSpec((1, N), lambda m, k: (0, 0)),
            ],
            out_specs=pl.BlockSpec((tm, N), lambda m, k: (m, 0)),
        ),
        compiler_params=pltpu.CompilerParams(
            dimension_semantics=("parallel", "arbitrary")),
    )(a.astype(jnp.bfloat16), w.astype(jnp.bfloat16), scale2, shift2)


# ----------------------------------------------------------------------------
# Kernel 2: fused fc head.
# acc = A @ W1 (K tiled), y = leaky(scale*acc + shift),
# out = sigmoid(sum(y * w2_row, lanes) + b2)            -> (M, 1)
# ----------------------------------------------------------------------------
def _fc_fused_kernel(a_ref, w1_ref, scale_ref, shift_ref, w2_ref, b2_ref,
                     o_ref, acc_ref):
    k = pl.program_id(1)

    @pl.when(k == 0)
    def _():
        acc_ref[...] = jnp.zeros_like(acc_ref)

    acc_ref[...] += jnp.dot(a_ref[...], w1_ref[...],
                            preferred_element_type=jnp.float32)

    @pl.when(k == pl.num_programs(1) - 1)
    def _():
        y = acc_ref[...] * scale_ref[...] + shift_ref[...]
        y = jnp.where(y >= 0.0, y, 0.2 * y)
        z = jnp.sum(y * w2_ref[...], axis=-1, keepdims=True) + b2_ref[...]
        o_ref[...] = pl.reciprocal(1.0 + jnp.exp(-z), approx=True)


def fc_fused(a, w1, scale, shift, w2_row, b2, tk=2048, tm_cap=256):
    """a: (M, K), w1: (K, N), w2_row: (1, N), b2: scalar -> f32 (M, 1)."""
    M, K = a.shape
    K2, N = w1.shape
    assert K == K2
    if K % tk != 0:
        tk = K
    nk = K // tk
    tm = _pick_tm(M, tm_cap)
    nm = M // tm
    scale2 = scale.reshape(1, N).astype(jnp.float32)
    shift2 = shift.reshape(1, N).astype(jnp.float32)
    w2r = w2_row.reshape(1, N).astype(jnp.float32)
    b2r = jnp.asarray(b2, jnp.float32).reshape(1, 1)
    return pl.pallas_call(
        _fc_fused_kernel,
        out_shape=jax.ShapeDtypeStruct((M, 1), jnp.float32),
        grid_spec=pltpu.PrefetchScalarGridSpec(
            num_scalar_prefetch=0,
            grid=(nm, nk),
            in_specs=[
                pl.BlockSpec((tm, tk), lambda m, k: (m, k)),
                pl.BlockSpec((tk, N), lambda m, k: (k, 0)),
                pl.BlockSpec((1, N), lambda m, k: (0, 0)),
                pl.BlockSpec((1, N), lambda m, k: (0, 0)),
                pl.BlockSpec((1, N), lambda m, k: (0, 0)),
                pl.BlockSpec((1, 1), lambda m, k: (0, 0)),
            ],
            out_specs=pl.BlockSpec((tm, 1), lambda m, k: (m, 0)),
            scratch_shapes=[pltpu.VMEM((tm, N), jnp.float32)],
        ),
        compiler_params=pltpu.CompilerParams(
            dimension_semantics=("parallel", "arbitrary")),
    )(a.astype(jnp.bfloat16), w1.astype(jnp.bfloat16), scale2, shift2,
      w2r, b2r)


# ----------------------------------------------------------------------------
# Glue: NHWC im2col -> (N*Ho*Wo, C*kh*kw), patch order (c, kh, kw).
# ----------------------------------------------------------------------------
def im2col_nhwc(x_nhwc, kh, kw, stride, pad):
    N, H, W, C = x_nhwc.shape
    x = jnp.pad(x_nhwc, ((0, 0), (pad, pad), (pad, pad), (0, 0)))
    Ho = (H + 2 * pad - kh) // stride + 1
    Wo = (W + 2 * pad - kw) // stride + 1
    cols = []
    for i in range(kh):
        for j in range(kw):
            cols.append(x[:, i:i + stride * Ho:stride,
                          j:j + stride * Wo:stride, :])    # (N, Ho, Wo, C)
    patches = jnp.stack(cols, axis=-1)                      # (N,Ho,Wo,C,kh*kw)
    patches = patches.reshape(N, Ho, Wo, C, kh, kw)
    return patches.reshape(N * Ho * Wo, C * kh * kw), Ho, Wo


# ----------------------------------------------------------------------------
# Discriminator forward (Pallas) and deterministic parameter init.
# ----------------------------------------------------------------------------
IN_H, IN_W, IN_DIM, OUT_DIM = 32, 64, 1 + 4, 1
FC_IN = 128 * (IN_H // 4) * (IN_W // 4)  # 128 * 8 * 16 = 16384


def init_params(key):
    ks = jax.random.split(key, 16)

    def w(k, shape, fan_in):
        return jax.random.normal(k, shape, jnp.float32) / np.sqrt(fan_in)

    p = {}
    p["w1"] = w(ks[0], (64, IN_DIM, 4, 4), IN_DIM * 16)
    p["b1"] = w(ks[1], (64,), IN_DIM * 16)
    p["w2"] = w(ks[2], (128, 64, 4, 4), 64 * 16)
    p["b2"] = w(ks[3], (128,), 64 * 16)
    # BatchNorm2d(128), eval mode
    p["g2"] = 1.0 + 0.1 * jax.random.normal(ks[4], (128,), jnp.float32)
    p["be2"] = 0.1 * jax.random.normal(ks[5], (128,), jnp.float32)
    p["m2"] = 0.1 * jax.random.normal(ks[6], (128,), jnp.float32)
    p["v2"] = jax.random.uniform(ks[7], (128,), jnp.float32, 0.5, 1.5)
    # fc1: Linear(16384, 1024) + BatchNorm1d(1024)
    p["fw1"] = w(ks[8], (1024, FC_IN), FC_IN)
    p["fb1"] = w(ks[9], (1024,), FC_IN)
    p["fg1"] = 1.0 + 0.1 * jax.random.normal(ks[10], (1024,), jnp.float32)
    p["fbe1"] = 0.1 * jax.random.normal(ks[11], (1024,), jnp.float32)
    p["fm1"] = 0.1 * jax.random.normal(ks[12], (1024,), jnp.float32)
    p["fv1"] = jax.random.uniform(ks[13], (1024,), jnp.float32, 0.5, 1.5)
    # fc2: Linear(1024, 1)
    p["fw2"] = w(ks[14], (OUT_DIM, 1024), 1024)
    p["fb2"] = w(ks[15], (OUT_DIM,), 1024)
    return p


def discriminator_forward(inp, label, p):
    x = jnp.concatenate([inp, label], axis=1)               # (N, 5, 32, 64)
    N = x.shape[0]
    x = x.transpose(0, 2, 3, 1)                             # NHWC (N,32,64,5)
    x = jnp.pad(x, ((0, 0), (0, 0), (0, 0), (0, 3)))        # pad C 5 -> 8

    # conv1: Conv2d(5, 64, 4, 2, 1) + LeakyReLU(0.2)   (K padded 80 -> 128)
    patches, Ho, Wo = im2col_nhwc(x, 4, 4, 2, 1)            # (N*16*32, 128)
    w1 = jnp.pad(p["w1"], ((0, 0), (0, 3), (0, 0), (0, 0)))
    w1 = w1.reshape(64, -1).T                               # (128, 64)
    y = matmul_epilogue(patches, w1, jnp.ones((64,), jnp.float32), p["b1"],
                        act="leaky")
    y = y.reshape(N, Ho, Wo, 64)                            # NHWC (N,16,32,64)

    # conv2: Conv2d(64, 128, 4, 2, 1) + BN(eval) + LeakyReLU(0.2)
    patches, Ho, Wo = im2col_nhwc(y, 4, 4, 2, 1)            # (N*8*16, 1024)
    w2 = p["w2"].reshape(128, -1).T                         # (1024, 128)
    s2 = p["g2"] / jnp.sqrt(p["v2"] + EPS)
    sh2 = s2 * (p["b2"] - p["m2"]) + p["be2"]
    y = matmul_epilogue(patches, w2, s2, sh2, act="leaky")  # (N*8*16, 128)
    y = y.reshape(N, Ho * Wo * 128)                         # NHWC flatten

    # fc1 weight columns reordered (C,H,W) -> (H,W,C) to match NHWC flatten,
    # so no activation transpose is needed (exactly equals torch's view).
    fw1 = p["fw1"].reshape(1024, 128, Ho, Wo)
    fw1 = fw1.transpose(0, 2, 3, 1).reshape(1024, -1)       # (1024, 16384)
    s = p["fg1"] / jnp.sqrt(p["fv1"] + EPS)
    sh = s * (p["fb1"] - p["fm1"]) + p["fbe1"]

    # fused fc1 + BN1d + LeakyReLU + fc2 + Sigmoid
    out = fc_fused(y, fw1.T, s, sh, p["fw2"], p["fb2"], tk=2048)
    return out                                              # (N, 1)


# ----------------------------------------------------------------------------
# Pure-JAX reference (f32, lax.conv, original NCHW layout).
# ----------------------------------------------------------------------------
def reference_forward(inp, label, p):
    dn = ("NCHW", "OIHW", "NCHW")
    z = jnp.concatenate([inp, label], axis=1)
    z = lax.conv_general_dilated(z, p["w1"], (2, 2), [(1, 1), (1, 1)],
                                 dimension_numbers=dn)
    z = z + p["b1"][None, :, None, None]
    z = jnp.where(z >= 0, z, 0.2 * z)
    z = lax.conv_general_dilated(z, p["w2"], (2, 2), [(1, 1), (1, 1)],
                                 dimension_numbers=dn)
    z = z + p["b2"][None, :, None, None]
    z = (p["g2"][None, :, None, None]
         * (z - p["m2"][None, :, None, None])
         / jnp.sqrt(p["v2"][None, :, None, None] + EPS)
         + p["be2"][None, :, None, None])
    z = jnp.where(z >= 0, z, 0.2 * z)
    z = z.reshape(z.shape[0], -1)
    z = z @ p["fw1"].T + p["fb1"]
    z = p["fg1"] * (z - p["fm1"]) / jnp.sqrt(p["fv1"] + EPS) + p["fbe1"]
    z = jnp.where(z >= 0, z, 0.2 * z)
    z = z @ p["fw2"].T + p["fb2"]
    return jax.nn.sigmoid(z)


if __name__ == "__main__":
    key = jax.random.PRNGKey(0)
    k_inp, k_lab, k_par = jax.random.split(key, 3)

    batch = 2
    inp = jax.random.normal(k_inp, (batch, 1, IN_H, IN_W), jnp.float32)
    label = jax.random.normal(k_lab, (batch, 4, IN_H, IN_W), jnp.float32)
    params = init_params(k_par)

    out = discriminator_forward(inp, label, params)
    out = jax.block_until_ready(out)
    assert out.shape == (batch, OUT_DIM), out.shape

    ref = jax.block_until_ready(reference_forward(inp, label, params))
    # bf16 MXU inputs (f32 accumulation) -> looser tolerance than pure f32.
    np.testing.assert_allclose(np.asarray(out), np.asarray(ref),
                               rtol=3e-2, atol=3e-2)
    print("KERNEL_OK")
</pallas_src>

<mosaic_0001>
module attributes {stable_mosaic.version = 11 : i64} {
  func.func @_mm_epilogue_kernel(%arg0: i32, %arg1: i32, %arg2: memref<256x128xbf16, #tpu.memory_space<vmem>>, %arg3: memref<128x64xbf16, #tpu.memory_space<vmem>>, %arg4: memref<1x64xf32, #tpu.memory_space<vmem>>, %arg5: memref<1x64xf32, #tpu.memory_space<vmem>>, %arg6: memref<256x64xf32, #tpu.memory_space<vmem>>) attributes {dimension_semantics = [#tpu.dimension_semantics<parallel>, #tpu.dimension_semantics<arbitrary>], iteration_bounds = array<i64: 4, 1>, scalar_prefetch = 0 : i64, scratch_operands = 0 : i64, tpu.core_type = #tpu.core_type<tc>, window_params = [{transform_indices = @transform_0, window_bounds = array<i64: 256, 128>}, {transform_indices = @transform_1, window_bounds = array<i64: 128, 64>}, {pipeline_mode = #tpu.pipeline_mode<synchronous>, transform_indices = @transform_2, window_bounds = array<i64: 1, 64>}, {pipeline_mode = #tpu.pipeline_mode<synchronous>, transform_indices = @transform_3, window_bounds = array<i64: 1, 64>}, {transform_indices = @transform_4, window_bounds = array<i64: 256, 64>}]} {
    %c0_i32 = arith.constant 0 : i32
    %0 = arith.cmpi eq, %arg1, %c0_i32 : i32
    %1 = arith.extui %0 : i1 to i32
    %c0_i32_0 = arith.constant 0 : i32
    %2 = arith.cmpi ne, %1, %c0_i32_0 : i32
    scf.if %2 {
      %cst_10 = arith.constant 0.000000e+00 : f32
      %12 = vector.broadcast %cst_10 : f32 to vector<256x64xf32>
      %c0_11 = arith.constant 0 : index
      %c0_12 = arith.constant 0 : index
      %13 = vector.load %arg6[%c0_11, %c0_12] : memref<256x64xf32, #tpu.memory_space<vmem>>, vector<256x64xf32>
      tpu.vector_store %arg6[%c0_11, %c0_12], %12 {strides = array<i32>} : memref<256x64xf32, #tpu.memory_space<vmem>>, vector<256x64xf32>,
    } else {
    }
    %c0 = arith.constant 0 : index
    %c0_1 = arith.constant 0 : index
    %3 = vector.load %arg6[%c0, %c0_1] : memref<256x64xf32, #tpu.memory_space<vmem>>, vector<256x64xf32>
    %c0_2 = arith.constant 0 : index
    %c0_3 = arith.constant 0 : index
    %4 = vector.load %arg2[%c0_2, %c0_3] : memref<256x128xbf16, #tpu.memory_space<vmem>>, vector<256x128xbf16>
    %c0_4 = arith.constant 0 : index
    %c0_5 = arith.constant 0 : index
    %5 = vector.load %arg3[%c0_4, %c0_5] : memref<128x64xbf16, #tpu.memory_space<vmem>>, vector<128x64xbf16>
    %cst = arith.constant dense<0.000000e+00> : vector<256x64xf32>
    %6 = tpu.matmul %4, %5, %cst {dimension_numbers = #tpu.dot_dimension_numbers<[1], [0], [0], [1], [0, 0, 1, 1], [], []>} : vector<256x128xbf16>, vector<128x64xbf16>, vector<256x64xf32> -> vector<256x64xf32>
    %7 = arith.addf %3, %6 : vector<256x64xf32>
    %c0_6 = arith.constant 0 : index
    %c0_7 = arith.constant 0 : index
    %8 = vector.load %arg6[%c0_6, %c0_7] : memref<256x64xf32, #tpu.memory_space<vmem>>, vector<256x64xf32>
    tpu.vector_store %arg6[%c0_6, %c0_7], %7 {strides = array<i32>} : memref<256x64xf32, #tpu.memory_space<vmem>>, vector<256x64xf32>,
    %c0_i32_8 = arith.constant 0 : i32
    %9 = arith.cmpi eq, %arg1, %c0_i32_8 : i32
    %10 = arith.extui %9 : i1 to i32
    %c0_i32_9 = arith.constant 0 : i32
    %11 = arith.cmpi ne, %10, %c0_i32_9 : i32
    scf.if %11 {
      %c0_10 = arith.constant 0 : index
      %c0_11 = arith.constant 0 : index
      %12 = vector.load %arg6[%c0_10, %c0_11] : memref<256x64xf32, #tpu.memory_space<vmem>>, vector<256x64xf32>
      %c0_12 = arith.constant 0 : index
      %c0_13 = arith.constant 0 : index
      %13 = vector.load %arg4[%c0_12, %c0_13] : memref<1x64xf32, #tpu.memory_space<vmem>>, vector<1x64xf32>
      %14 = vector.broadcast %13 : vector<1x64xf32> to vector<256x64xf32>
      %15 = arith.mulf %12, %14 : vector<256x64xf32>
      %c0_14 = arith.constant 0 : index
      %c0_15 = arith.constant 0 : index
      %16 = vector.load %arg5[%c0_14, %c0_15] : memref<1x64xf32, #tpu.memory_space<vmem>>, vector<1x64xf32>
      %17 = vector.broadcast %16 : vector<1x64xf32> to vector<256x64xf32>
      %18 = arith.addf %15, %17 : vector<256x64xf32>
      %cst_16 = arith.constant 0.000000e+00 : f32
      %19 = vector.broadcast %cst_16 : f32 to vector<256x64xf32>
      %20 = arith.cmpf oge, %18, %19 : vector<256x64xf32>
      %cst_17 = arith.constant 2.000000e-01 : f32
      %21 = vector.broadcast %cst_17 : f32 to vector<256x64xf32>
      %22 = arith.mulf %21, %18 : vector<256x64xf32>
      %23 = arith.select %20, %18, %22 : vector<256x64xi1>, vector<256x64xf32>
      %c0_18 = arith.constant 0 : index
      %c0_19 = arith.constant 0 : index
      %24 = vector.load %arg6[%c0_18, %c0_19] : memref<256x64xf32, #tpu.memory_space<vmem>>, vector<256x64xf32>
      tpu.vector_store %arg6[%c0_18, %c0_19], %23 {strides = array<i32>} : memref<256x64xf32, #tpu.memory_space<vmem>>, vector<256x64xf32>,
    } else {
    }
    return
  }
  func.func @transform_0(%arg0: i32, %arg1: i32) -> (i32, i32) {
    %c0_i32 = arith.constant 0 : i32
    return %arg0, %arg1 : i32, i32
  }
  func.func @transform_1(%arg0: i32, %arg1: i32) -> (i32, i32) {
    %c0_i32 = arith.constant 0 : i32
    %c0_i32_0 = arith.constant 0 : i32
    return %arg1, %c0_i32 : i32, i32
  }
  func.func @transform_2(%arg0: i32, %arg1: i32) -> (i32, i32) {
    %c0_i32 = arith.constant 0 : i32
    %c0_i32_0 = arith.constant 0 : i32
    %c0_i32_1 = arith.constant 0 : i32
    return %c0_i32, %c0_i32_0 : i32, i32
  }
  func.func @transform_3(%arg0: i32, %arg1: i32) -> (i32, i32) {
    %c0_i32 = arith.constant 0 : i32
    %c0_i32_0 = arith.constant 0 : i32
    %c0_i32_1 = arith.constant 0 : i32
    return %c0_i32, %c0_i32_0 : i32, i32
  }
  func.func @transform_4(%arg0: i32, %arg1: i32) -> (i32, i32) {
    %c0_i32 = arith.constant 0 : i32
    %c0_i32_0 = arith.constant 0 : i32
    return %arg0, %c0_i32 : i32, i32
  }
}

</mosaic_0001>

<bundles_post_ra>
// kernel: tpu_custom_call.1
= control target key start
LH: loop header
LB: loop body
LE: loop exit
PB: predicated region body
PF: predicated region fallthrough
CT: control target
= control target key end

     0   :  { %9 = vsyncpa [#allocation3], 0  ;;  %s1929_s0 = inlined_call_operand.hbm [shape: bf16[1024,128], index: 0, kind: input, shape index: {}]   ;;  %s1930_s1 = inlined_call_operand.vmem [shape: bf16[128,64], index: 1, kind: input, shape index: {}]   ;;  %s1931_s2 = inlined_call_operand.vmem [shape: f32[1,64], index: 2, kind: input, shape index: {}]   ;;  %s1932_s3 = inlined_call_operand.vmem [shape: f32[1,64], index: 3, kind: input, shape index: {}]   ;;  %s1933_s4 = inlined_call_operand.vmem [shape: f32[1024,64], index: 4, kind: output, shape index: {}]  }
   0x1   :  { %11 = vsyncpa [#allocation3 + $0x1], 0  ;;  %s1401_s15 = smov 0   ;;  %s1403_s16 = smov 0  }
   0x2   :  { %s1405_s17 = smov 0   ;;  %s1407_s18 = smov 0  }
   0x3   :  { %s1409_s19 = smov 0   ;;  %s1411_s20 = smov 0  }
   0x4 LB: > { %s1079_s21 = sadd.s32 4294967295, %s1370_s20   ;;  %s29_s22 = sadd.s32 1, %s1366_s19  ;;  %s1370_s20 = sphi %s1411_s20, %s17_s20   ;;  %s1366_s19 = sphi %s1409_s19, %s1941_s19   ;;  %s1362_s18 = sphi %s1407_s18, %s1940_s18   ;;  %s1358_s17 = sphi %s1405_s17, %s1939_s17   ;;  %s1354_s16 = sphi %s1403_s16, %s1938_s16   ;;  %s1350_s15 = sphi %s1401_s15, %s1937_s15  }
   0x5   : > { %p31_p0 = scmp.ge.s32.totalorder %s29_s22, 4  ;;  %s38_s23 = sadd.s32 1, %s1358_s17 }
   0x6   : > { %p45_p1 = scmp.ne.s32.totalorder %s1358_s17, %s1354_s16  ;;  %p46_p2 = scmp.eq.s32.totalorder %s1370_s20, 0 }
   0x7   : > { %s1943_s22 = smov (%p31_p0, %s29_s22), 0  ;;  %p51_p4 = scmp.ne.s32.totalorder %s1354_s16, %s1350_s15 }
   0x8   : > { %p1437_p3 = por %p46_p2, %p45_p1  ;;  %s33_s25 = ssub.s32 %s1366_s19, %s1943_s22 }
   0x9   : > { %p52_p5 = scmp.eq.s32.totalorder %s1079_s21, 0  ;;  %p36_p6 = scmp.eq.s32.totalorder %s33_s25, 0 }
   0xa   : > { %p1214_p8 = scmp.lt.s32.totalorder %s1370_s20, 4  ;;  %s184_s28 = sand.u32 1, %s1358_s17  }
   0xb   : > { %p1444_p7 = por %p52_p5, %p51_p4  ;;  %s1119_s29 = sshll.u32 %s1366_s19, 11 }
   0xc   : > { %s1450_s27 = scalar_select %p36_p6, %s1358_s17, %s38_s23  }
   0xd   : > { %s1084_s30 = sshll.u32 %s184_s28, 7  ;;  %s1457_s7 = scalar_lea.hbm %s1929_s0, %s1119_s29 }
   0xe   : > { %s188_s8 = scalar_lea.vmem [#allocation2], %s1084_s30  ;;  %p1461_p9 = pnand %p1214_p8, %p1437_p3 }
   0xf   : > { %s196_s9 = sshll.u32 %s188_s8, 4  ;;  %s1467_s11 = scalar_lea.sflag [#allocation3], %s184_s28  ;;  %s1465_s9 = int_to_ptr.vmem [resolvable:$true] %s196_s9 }
  0x10   : > { %s1290_s12 = scalar_lea.hbm %s1457_s7, 2048  ;;  %p1292_p11 = pneg %p1461_p9 }
  0x11   : > { %p1291_p10 = scmp.ne.s32.totalorder %s1457_s7, %s1290_s12  ;;  %s1295_s15 = scalar_lea.hbm %s1929_s0, 8192 }
  0x12   : > { %p1296_p0 = scmp.lt.u32.totalorder %s1457_s7, %s1929_s0  ;;  %p1297_p1 = scmp.lt.u32.totalorder %s1295_s15, %s1290_s12 }
  0x13   : > { %p1293_p12 = pnand %p1292_p11, %p1291_p10  ;;  %p1299_p3 = scmp.lt.u32.totalorder %s1290_s12, %s1457_s7 }
  0x14   : > { %p1298_p2 = por %p1297_p1, %p1296_p0 }
  0x15   : > { %p1294_p13 = pneg %p1293_p12 }
  0x16   : > { %p1300_p4 = por %p1299_p3, %p1298_p2 }
  0x18   : > { %p1301_p5 = pnand %p1300_p4, %p1294_p13 }
  0x1a   : > { %1304 = shalt.err (!%p1301_p5)
}
  0x1b   : > { %s1305_s24 = scalar_lea.vmem %s1465_s9, 2048  ;;  %s1372_s25 = smov [#allocation2]  }
  0x1c   : > { %p1306_p6 = scmp.ne.s32.totalorder %s1465_s9, %s1305_s24  ;;  %s1310_s28 = sshll.u32 %s1372_s25, 4  ;;  %s1311_s28 = int_to_ptr.vmem [resolvable:$false] %s1310_s28 }
  0x1d   : > { %s1312_s29 = scalar_lea.vmem %s1311_s28, 4096  ;;  %p1313_p12 = scmp.lt.s32.totalorder %s1465_s9, %s1311_s28 }
  0x1e   : > { %p1308_p8 = pnand %p1306_p6, %p1292_p11  ;;  %p1314_p0 = scmp.lt.s32.totalorder %s1312_s29, %s1305_s24 }
  0x20   : > { %p1309_p10 = pneg %p1308_p8  ;;  %p1315_p1 = por %p1314_p0, %p1313_p12 }
  0x22   : > { %p1316_p2 = pnand %p1315_p1, %p1309_p10 }
  0x24   : > { %1319 = shalt.err (!%p1316_p2)
}
  0x25   : > { %s1373_s30 = smov 64   ;;  %s1374_s5 = smov 4  }
  0x26   : > { %1213 = dma.hbm_to_vmem [thread:$0]  (!%p1461_p9), %s1457_s7, 2048, %s1465_s9, %s1467_s11, %s1373_s30, %s1373_s30, %s1374_s5  }
  0x27   : > { %p1087_p11 = scmp.ge.s32.totalorder %s1370_s20, 1  ;;  %p204_p13 = scmp.lt.s32.totalorder %s1370_s20, 5 }
  0x29   : > { %p205_p3 = pnand %p1087_p11, %p204_p13 }
  0x2a   : > { %s210_s6 = sand.u32 (!%p205_p3), 1, %s1354_s16  }
  0x2b   : > { %208 = sbr.rel (%p205_p3) target bundleno = 361 (0x169), region = 36  ;;  %s1088_s8 = sshll.u32 (!%p205_p3), %s210_s6, 7 }
  0x2c   : > { %s211_s12 = scalar_lea.sflag (!%p205_p3), [#allocation3], %s210_s6  ;;  %s1498_s13 = scalar_lea.vmem (!%p205_p3), [#allocation2], %s1088_s8 }
  0x32   : > { %1345 = dma.done.wait (%p1444_p7), %s211_s12, 2048  }
  0x33   : > { %1347 = vsyncadd (%p1444_p7), %s211_s12, 4294965248  ;;  %s1089_s14 = sshll.u32 %s1362_s18, 5  ;;  %vm262_vm0 = vcmask 523264   ;;  %v1266_v0 = vld [vmem:[%s1930_s1] sm:$0xff]   ;;  %v1375_v1 = vmov 0.0   ;;  %v1267_v2 = vld [vmem:[%s1930_s1 + $0x8] sm:$0xff]  }
  0x34   : > { %p252_p4 = scmp.lt.s32.totalorder %s1089_s14, 127  ;;  %1144 = vmatprep.subr.bf16.mxu0 %v1266_v0  ;;  %1192 = vmatprep.subr.bf16.mxu1 %v1266_v0  ;;  %v1268_v3 = vld [vmem:[%s1930_s1 + $0x10] sm:$0xff]   ;;  %v1269_v4 = vld [vmem:[%s1930_s1 + $0x18] sm:$0xff]   ;;  %v1274_v5 = vld [vmem:[%s1498_s13] sm:$0xff]  }
  0x35   : > { %1145 = vmatpush3.bf16.msra.mxu0 %v1266_v0  ;;  %1200 = vmatpush3.bf16.msra.mxu1 %v1266_v0  ;;  %v1275_v6 = vld [vmem:[%s1498_s13 + $0x40] sm:$0xff]   ;;  %v1271_v8 = vld [vmem:[%s1930_s1 + $0x28] sm:$0xff]   ;;  %v1272_v9 = vld [vmem:[%s1930_s1 + $0x30] sm:$0xff]  }
  0x36   : > { %s1945_s14 = smov (!%p252_p4, %s1089_s14), 127  ;;  %1146 = vmatprep.subr.bf16.mxu0 %v1267_v2  ;;  %1193 = vmatprep.subr.bf16.mxu1 %v1267_v2  ;;  %v1270_v7 = vld [vmem:[%s1930_s1 + $0x20] sm:$0xff]   ;;  %v1273_v10 = vld [vmem:[%s1930_s1 + $0x38] sm:$0xff]   ;;  %v1276_v11 = vld [vmem:[%s1498_s13 + $0x8] sm:$0xff]  }
  0x37   : > { %s1090_s7 = sshll.u32 %s1945_s14, 3  ;;  %1160 = vmatprep.mubr.bf16.mxu0 %v1274_v5  ;;  %1176 = vmatprep.mubr.bf16.mxu1 %v1275_v6  ;;  %v1277_v12 = vld [vmem:[%s1498_s13 + $0x48] sm:$0xff]   ;;  %v1278_v13 = vld [vmem:[%s1498_s13 + $0x10] sm:$0xff]   ;;  %v1280_v15 = vld [vmem:[%s1498_s13 + $0x18] sm:$0xff]  }
  0x38   : > { %s1508_s11 = scalar_lea.vmem %s1933_s4, %s1090_s7  ;;  %v1279_v14 = vld [vmem:[%s1498_s13 + $0x50] sm:$0xff]   ;;  %v1281_v16 = vld [vmem:[%s1498_s13 + $0x58] sm:$0xff]   ;;  %v1282_v17 = vld [vmem:[%s1498_s13 + $0x20] sm:$0xff]  }
  0x39   : > { %265 = vst.msk [vmem:[%s1508_s11 + $0x10] sm:$0xff] %vm262_vm0, %v1375_v1  ;;  %263 = vst.msk [vmem:[%s1508_s11] sm:$0xff] %vm262_vm0, %v1375_v1  ;;  %1147 = vmatpush3.bf16.msra.mxu0 %v1267_v2  ;;  %1201 = vmatpush3.bf16.msra.mxu1 %v1267_v2  ;;  %v1283_v18 = vld [vmem:[%s1498_s13 + $0x60] sm:$0xff]   ;;  %v1284_v19 = vld [vmem:[%s1498_s13 + $0x28] sm:$0xff]  }
  0x3a   : > { %264 = vst.msk [vmem:[%s1508_s11 + $0x8] sm:$0xff] %vm262_vm0, %v1375_v1  ;;  %266 = vst.msk [vmem:[%s1508_s11 + $0x18] sm:$0xff] %vm262_vm0, %v1375_v1  ;;  %1148 = vmatprep.subr.bf16.mxu0 %v1268_v3  ;;  %1194 = vmatprep.subr.bf16.mxu1 %v1268_v3  ;;  %v1285_v20 = vld [vmem:[%s1498_s13 + $0x68] sm:$0xff]   ;;  %v1286_v21 = vld [vmem:[%s1498_s13 + $0x30] sm:$0xff]  }
  0x3b   : > { %267 = vst.msk [vmem:[%s1508_s11 + $0x20] sm:$0xff] %vm262_vm0, %v1375_v1  ;;  %268 = vst.msk [vmem:[%s1508_s11 + $0x28] sm:$0xff] %vm262_vm0, %v1375_v1  ;;  %v1287_v22 = vld [vmem:[%s1498_s13 + $0x70] sm:$0xff]   ;;  %v1288_v23 = vld [vmem:[%s1498_s13 + $0x38] sm:$0xff]  }
  0x3c   : > { %269 = vst.msk [vmem:[%s1508_s11 + $0x30] sm:$0xff] %vm262_vm0, %v1375_v1  ;;  %270 = vst.msk [vmem:[%s1508_s11 + $0x38] sm:$0xff] %vm262_vm0, %v1375_v1  ;;  %v1289_v24 = vld [vmem:[%s1498_s13 + $0x78] sm:$0xff]   ;;  %v1645_v53 = vld [vmem:[%s1931_s2] ss:$0 sm:$0xff] }
  0x3d   : > { %271 = vst.msk [vmem:[%s1508_s11 + $0x40] sm:$0xff] %vm262_vm0, %v1375_v1  ;;  %272 = vst.msk [vmem:[%s1508_s11 + $0x48] sm:$0xff] %vm262_vm0, %v1375_v1  ;;  %1149 = vmatpush3.bf16.msra.mxu0 %v1268_v3  ;;  %1202 = vmatpush3.bf16.msra.mxu1 %v1268_v3 }
  0x3e   : > { %273 = vst.msk [vmem:[%s1508_s11 + $0x50] sm:$0xff] %vm262_vm0, %v1375_v1  ;;  %274 = vst.msk [vmem:[%s1508_s11 + $0x58] sm:$0xff] %vm262_vm0, %v1375_v1  ;;  %1150 = vmatprep.subr.bf16.mxu0 %v1269_v4  ;;  %1195 = vmatprep.subr.bf16.mxu1 %v1269_v4 }
  0x3f   : > { %275 = vst.msk [vmem:[%s1508_s11 + $0x60] sm:$0xff] %vm262_vm0, %v1375_v1  ;;  %276 = vst.msk [vmem:[%s1508_s11 + $0x68] sm:$0xff] %vm262_vm0, %v1375_v1 }
  0x40   : > { %277 = vst.msk [vmem:[%s1508_s11 + $0x70] sm:$0xff] %vm262_vm0, %v1375_v1  ;;  %278 = vst.msk [vmem:[%s1508_s11 + $0x78] sm:$0xff] %vm262_vm0, %v1375_v1  ;;  %v297_v25 = vld [vmem:[%s1508_s11 + $0x10] sm:$0xff]  ;;  %v295_v27 = vld [vmem:[%s1508_s11] sm:$0xff] }
  0x41   : > { %279 = vst.msk [vmem:[%s1508_s11 + $0x80] sm:$0xff] %vm262_vm0, %v1375_v1  ;;  %280 = vst.msk [vmem:[%s1508_s11 + $0x88] sm:$0xff] %vm262_vm0, %v1375_v1  ;;  %1151 = vmatpush3.bf16.msra.mxu0 %v1269_v4  ;;  %1203 = vmatpush3.bf16.msra.mxu1 %v1269_v4  ;;  %v298_v31 = vld [vmem:[%s1508_s11 + $0x18] sm:$0xff]  ;;  %v296_v37 = vld [vmem:[%s1508_s11 + $0x8] sm:$0xff] }
  0x42   : > { %281 = vst.msk [vmem:[%s1508_s11 + $0x90] sm:$0xff] %vm262_vm0, %v1375_v1  ;;  %282 = vst.msk [vmem:[%s1508_s11 + $0x98] sm:$0xff] %vm262_vm0, %v1375_v1  ;;  %1152 = vmatprep.subr.bf16.mxu0 %v1270_v7  ;;  %1196 = vmatprep.subr.bf16.mxu1 %v1270_v7  ;;  %v299_v51 = vld [vmem:[%s1508_s11 + $0x20] sm:$0xff]  ;;  %v300_v62 = vld [vmem:[%s1508_s11 + $0x28] sm:$0xff] }
  0x43   : > { %283 = vst.msk [vmem:[%s1508_s11 + $0xa0] sm:$0xff] %vm262_vm0, %v1375_v1  ;;  %284 = vst.msk [vmem:[%s1508_s11 + $0xa8] sm:$0xff] %vm262_vm0, %v1375_v1  ;;  %v301_v49 = vld [vmem:[%s1508_s11 + $0x30] sm:$0xff]  ;;  %v302_v56 = vld [vmem:[%s1508_s11 + $0x38] sm:$0xff] }
  0x44   : > { %285 = vst.msk [vmem:[%s1508_s11 + $0xb0] sm:$0xff] %vm262_vm0, %v1375_v1  ;;  %286 = vst.msk [vmem:[%s1508_s11 + $0xb8] sm:$0xff] %vm262_vm0, %v1375_v1 }
  0x45   : > { %287 = vst.msk [vmem:[%s1508_s11 + $0xc0] sm:$0xff] %vm262_vm0, %v1375_v1  ;;  %288 = vst.msk [vmem:[%s1508_s11 + $0xc8] sm:$0xff] %vm262_vm0, %v1375_v1  ;;  %1153 = vmatpush3.bf16.msra.mxu0 %v1270_v7  ;;  %1204 = vmatpush3.bf16.msra.mxu1 %v1270_v7 }
  0x46   : > { %289 = vst.msk [vmem:[%s1508_s11 + $0xd0] sm:$0xff] %vm262_vm0, %v1375_v1  ;;  %290 = vst.msk [vmem:[%s1508_s11 + $0xd8] sm:$0xff] %vm262_vm0, %v1375_v1  ;;  %1154 = vmatprep.subr.bf16.mxu0 %v1271_v8  ;;  %1197 = vmatprep.subr.bf16.mxu1 %v1271_v8 }
  0x47   : > { %291 = vst.msk [vmem:[%s1508_s11 + $0xe0] sm:$0xff] %vm262_vm0, %v1375_v1  ;;  %292 = vst.msk [vmem:[%s1508_s11 + $0xe8] sm:$0xff] %vm262_vm0, %v1375_v1 }
  0x48   : > { %293 = vst.msk [vmem:[%s1508_s11 + $0xf0] sm:$0xff] %vm262_vm0, %v1375_v1  ;;  %294 = vst.msk [vmem:[%s1508_s11 + $0xf8] sm:$0xff] %vm262_vm0, %v1375_v1  ;;  %v311_v28 = vld [vmem:[%s1508_s11 + $0x80] sm:$0xff]  ;;  %v312_v38 = vld [vmem:[%s1508_s11 + $0x88] sm:$0xff] }
  0x49   : > { %1155 = vmatpush3.bf16.msra.mxu0 %v1271_v8  ;;  %1205 = vmatpush3.bf16.msra.mxu1 %v1271_v8  ;;  %v313_v26 = vld [vmem:[%s1508_s11 + $0x90] sm:$0xff]  ;;  %v314_v32 = vld [vmem:[%s1508_s11 + $0x98] sm:$0xff]  ;;  %v1655_v1 = vld [vmem:[%s1932_s3] ss:$0 sm:$0xff] }
  0x4a   : > { %1156 = vmatprep.subr.bf16.mxu0 %v1272_v9  ;;  %1198 = vmatprep.subr.bf16.mxu1 %v1272_v9  ;;  %v315_v52 = vld [vmem:[%s1508_s11 + $0xa0] sm:$0xff]  ;;  %v316_v63 = vld [vmem:[%s1508_s11 + $0xa8] sm:$0xff] }
  0x4b   : > { %v317_v50 = vld [vmem:[%s1508_s11 + $0xb0] sm:$0xff]  ;;  %v318_v57 = vld [vmem:[%s1508_s11 + $0xb8] sm:$0xff] }
  0x4d   : > { %1157 = vmatpush3.bf16.msra.mxu0 %v1272_v9  ;;  %1206 = vmatpush3.bf16.msra.mxu1 %v1272_v9 }
  0x4e   : > { %1158 = vmatprep.subr.bf16.mxu0 %v1273_v10  ;;  %1199 = vmatprep.subr.bf16.mxu1 %v1273_v10 }
  0x51   : > { %1159 = vmatpush3.bf16.msra.mxu0 %v1273_v10  ;;  %1207 = vmatpush3.bf16.msra.mxu1 %v1273_v10 }
  0x54   : > { %1161 = vmatmul.mubr.bf16.vlgmr.msra.gmra.mrb[0].mxu0 %v1276_v11  ;;  %1177 = vmatmul.mubr.bf16.vlgmr.msra.gmra.mrb[0].mxu1 %v1277_v12 }
  0x55   : > { %1164 = vmatprep.mubr.bf16.mxu0 %v1278_v13  ;;  %1180 = vmatprep.mubr.bf16.mxu1 %v1279_v14 }
  0x5c   : > { %1165 = vmatmul.mubr.bf16.gmra.mrb[4].mxu0 %v1280_v15  ;;  %1181 = vmatmul.mubr.bf16.gmra.mrb[4].mxu1 %v1281_v16 }
  0x5d   : > { %1168 = vmatprep.mubr.bf16.mxu0 %v1282_v17  ;;  %1184 = vmatprep.mubr.bf16.mxu1 %v1283_v18 }
  0x64   : > { %1169 = vmatmul.mubr.bf16.gmra.mrb[8].mxu0 %v1284_v19  ;;  %1185 = vmatmul.mubr.bf16.gmra.mrb[8].mxu1 %v1285_v20 }
  0x65   : > { %1172 = vmatprep.mubr.bf16.mxu0 %v1286_v21  ;;  %1188 = vmatprep.mubr.bf16.mxu1 %v1287_v22 }
  0x6c   : > { %1173 = vmatmul.mubr.bf16.gmra.mrb[12].mxu0 %v1288_v23  ;;  %1189 = vmatmul.mubr.bf16.gmra.mrb[12].mxu1 %v1289_v24 }
 0x127   : > { %v1162_v29 = vpop.f32.mrb[0].mxu0  ;;  %v1178_v30 = vpop.f32.mrb[0].mxu1 }
 0x128   : > { %v682_v33 = vadd.f32 %v1162_v29, %v297_v25  ;;  %v698_v34 = vadd.f32 %v1178_v30, %v313_v26  ;;  %v553_v35 = vpop.f32.mrb[1].mxu0  ;;  %v617_v36 = vpop.f32.mrb[1].mxu1 }
 0x129   : > { %v680_v39 = vadd.f32 %v553_v35, %v295_v27  ;;  %v696_v40 = vadd.f32 %v617_v36, %v311_v28  ;;  %v1163_v41 = vpop.f32.mrb[2].mxu0  ;;  %v1179_v42 = vpop.f32.mrb[2].mxu1 }
 0x12a   : > { %715 = vst.msk [vmem:[%s1508_s11 + $0x10] sm:$0xff] %vm262_vm0, %v682_v33  ;;  %731 = vst.msk [vmem:[%s1508_s11 + $0x90] sm:$0xff] %vm262_vm0, %v698_v34  ;;  %v683_v43 = vadd.f32 %v1163_v41, %v298_v31  ;;  %v699_v44 = vadd.f32 %v1179_v42, %v314_v32  ;;  %v556_v45 = vpop.f32.mrb[3].mxu0  ;;  %v620_v46 = vpop.f32.mrb[3].mxu1 }
 0x12b   : > { %713 = vst.msk [vmem:[%s1508_s11] sm:$0xff] %vm262_vm0, %v680_v39  ;;  %729 = vst.msk [vmem:[%s1508_s11 + $0x80] sm:$0xff] %vm262_vm0, %v696_v40  ;;  %v681_v47 = vadd.f32 %v556_v45, %v296_v37  ;;  %v697_v48 = vadd.f32 %v620_v46, %v312_v38 }
 0x12c   : > { %716 = vst.msk [vmem:[%s1508_s11 + $0x18] sm:$0xff] %vm262_vm0, %v683_v43  ;;  %732 = vst.msk [vmem:[%s1508_s11 + $0x98] sm:$0xff] %vm262_vm0, %v699_v44 }
 0x12d   : > { %714 = vst.msk [vmem:[%s1508_s11 + $0x8] sm:$0xff] %vm262_vm0, %v681_v47  ;;  %730 = vst.msk [vmem:[%s1508_s11 + $0x88] sm:$0xff] %vm262_vm0, %v697_v48 }
 0x12f   : > { %v1166_v54 = vpop.f32.mrb[4].mxu0  ;;  %v1182_v55 = vpop.f32.mrb[4].mxu1 }
 0x130   : > { %v686_v58 = vadd.f32 %v1166_v54, %v301_v49  ;;  %v702_v59 = vadd.f32 %v1182_v55, %v317_v50  ;;  %v569_v60 = vpop.f32.mrb[5].mxu0  ;;  %v633_v61 = vpop.f32.mrb[5].mxu1 }
 0x131   : > { %v750_v0 = vld [vmem:[%s1508_s11 + $0x10] sm:$0xff]  ;;  %v684_v3 = vadd.f32 %v569_v60, %v299_v51  ;;  %v700_v4 = vadd.f32 %v633_v61, %v315_v52  ;;  %v1167_v5 = vpop.f32.mrb[6].mxu0  ;;  %v1183_v6 = vpop.f32.mrb[6].mxu1 }
 0x132   : > { %v766_v2 = vld [vmem:[%s1508_s11 + $0x90] sm:$0xff]  ;;  %v789_v7 = vmul.f32 %v1645_v53, %v750_v0  ;;  %v748_v9 = vld [vmem:[%s1508_s11] sm:$0xff]  ;;  %719 = vst.msk [vmem:[%s1508_s11 + $0x30] sm:$0xff] %vm262_vm0, %v686_v58  ;;  %735 = vst.msk [vmem:[%s1508_s11 + $0xb0] sm:$0xff] %vm262_vm0, %v702_v59  ;;  %v687_v11 = vadd.f32 %v1167_v5, %v302_v56  ;;  %v703_v12 = vadd.f32 %v1183_v6, %v318_v57  ;;  %v572_v13 = vpop.f32.mrb[7].mxu0  ;;  %v636_v14 = vpop.f32.mrb[7].mxu1 }
 0x133   : > { %v805_v8 = vmul.f32 %v1645_v53, %v766_v2  ;;  %v764_v10 = vld [vmem:[%s1508_s11 + $0x80] sm:$0xff]  ;;  %v787_v15 = vmul.f32 %v1645_v53, %v748_v9  ;;  %v751_v17 = vld [vmem:[%s1508_s11 + $0x18] sm:$0xff]  ;;  %717 = vst.msk [vmem:[%s1508_s11 + $0x20] sm:$0xff] %vm262_vm0, %v684_v3  ;;  %733 = vst.msk [vmem:[%s1508_s11 + $0xa0] sm:$0xff] %vm262_vm0, %v700_v4  ;;  %v685_v19 = vadd.f32 %v572_v13, %v300_v62 }
 0x134   : > { %v803_v16 = vmul.f32 %v1645_v53, %v764_v10  ;;  %v767_v18 = vld [vmem:[%s1508_s11 + $0x98] sm:$0xff]  ;;  %v701_v20 = vadd.f32 %v636_v14, %v316_v63  ;;  %v828_v21 = vadd.f32 %v1655_v1, %v789_v7  ;;  %v790_v23 = vmul.f32 %v1645_v53, %v751_v17  ;;  %v749_v25 = vld [vmem:[%s1508_s11 + $0x8] sm:$0xff]  ;;  %720 = vst.msk [vmem:[%s1508_s11 + $0x38] sm:$0xff] %vm262_vm0, %v687_v11 }
 0x135   : > { %v844_v22 = vadd.f32 %v1655_v1, %v805_v8  ;;  %v806_v24 = vmul.f32 %v1645_v53, %v767_v18  ;;  %v765_v26 = vld [vmem:[%s1508_s11 + $0x88] sm:$0xff]  ;;  %736 = vst.msk [vmem:[%s1508_s11 + $0xb8] sm:$0xff] %vm262_vm0, %v703_v12  ;;  %v826_v27 = vadd.f32 %v1655_v1, %v787_v15  ;;  %v788_v29 = vmul.f32 %v1645_v53, %v749_v25 }
 0x136   : > { %v842_v28 = vadd.f32 %v1655_v1, %v803_v16  ;;  %v804_v30 = vmul.f32 %v1645_v53, %v765_v26  ;;  %718 = vst.msk [vmem:[%s1508_s11 + $0x28] sm:$0xff] %vm262_vm0, %v685_v19  ;;  %734 = vst.msk [vmem:[%s1508_s11 + $0xa8] sm:$0xff] %vm262_vm0, %v701_v20  ;;  %vm860_vm1 = vcmp.ge.f32.partialorder %v828_v21, 0.0  ;;  %v892_v31 = vmul.f32 0.2, %v828_v21 }
 0x137   : > { %vm876_vm2 = vcmp.ge.f32.partialorder %v844_v22, 0.0  ;;  %v908_v32 = vmul.f32 0.2, %v844_v22  ;;  %vm858_vm3 = vcmp.ge.f32.partialorder %v826_v27, 0.0  ;;  %v890_v33 = vmul.f32 0.2, %v826_v27 }
 0x138   : > { %vm874_vm4 = vcmp.ge.f32.partialorder %v842_v28, 0.0  ;;  %v906_v34 = vmul.f32 0.2, %v842_v28  ;;  %v924_v35 = vsel %vm860_vm1, %v828_v21, %v892_v31  ;;  %v829_v37 = vadd.f32 %v1655_v1, %v790_v23  ;;  %v1694_v39 = vpop.f32.mrb[8].mxu0  ;;  %v1696_v40 = vpop.f32.mrb[8].mxu1  ;;  %v305_v23 = vld [vmem:[%s1508_s11 + $0x50] sm:$0xff] }
 0x139   : > { %v940_v36 = vsel %vm876_vm2, %v844_v22, %v908_v32  ;;  %v845_v38 = vadd.f32 %v1655_v1, %v806_v24  ;;  %956 = vst.msk [vmem:[%s1508_s11 + $0x10] sm:$0xff] %vm262_vm0, %v924_v35  ;;  %v922_v41 = vsel %vm858_vm3, %v826_v27, %v890_v33  ;;  %v827_v43 = vadd.f32 %v1655_v1, %v788_v29  ;;  %v754_v45 = vld [vmem:[%s1508_s11 + $0x30] sm:$0xff]  ;;  %v1706_v47 = vpop.f32.mrb[9].mxu0  ;;  %v1708_v48 = vpop.f32.mrb[9].mxu1  ;;  %v303_v29 = vld [vmem:[%s1508_s11 + $0x40] sm:$0xff] }
 0x13a   : > { %972 = vst.msk [vmem:[%s1508_s11 + $0x90] sm:$0xff] %vm262_vm0, %v940_v36  ;;  %v938_v42 = vsel %vm874_vm4, %v842_v28, %v906_v34  ;;  %v843_v44 = vadd.f32 %v1655_v1, %v804_v30  ;;  %v770_v46 = vld [vmem:[%s1508_s11 + $0xb0] sm:$0xff]  ;;  %954 = vst.msk [vmem:[%s1508_s11] sm:$0xff] %vm262_vm0, %v922_v41  ;;  %vm861_vm5 = vcmp.ge.f32.partialorder %v829_v37, 0.0  ;;  %v893_v49 = vmul.f32 0.2, %v829_v37 }
 0x13b   : > { %970 = vst.msk [vmem:[%s1508_s11 + $0x80] sm:$0xff] %vm262_vm0, %v938_v42  ;;  %vm877_vm6 = vcmp.ge.f32.partialorder %v845_v38, 0.0  ;;  %v909_v50 = vmul.f32 0.2, %v845_v38  ;;  %vm859_vm7 = vcmp.ge.f32.partialorder %v827_v43, 0.0  ;;  %v793_v56 = vmul.f32 %v1645_v53, %v754_v45  ;;  %v752_v58 = vld [vmem:[%s1508_s11 + $0x20] sm:$0xff] }
 0x13c   : > { %v891_v51 = vmul.f32 0.2, %v827_v43  ;;  %vm875_vm8 = vcmp.ge.f32.partialorder %v843_v44, 0.0  ;;  %v907_v52 = vmul.f32 0.2, %v843_v44  ;;  %v925_v54 = vsel %vm861_vm5, %v829_v37, %v893_v49  ;;  %v768_v59 = vld [vmem:[%s1508_s11 + $0xa0] sm:$0xff] }
 0x13d   : > { %v941_v55 = vsel %vm877_vm6, %v845_v38, %v909_v50  ;;  %v809_v57 = vmul.f32 %v1645_v53, %v770_v46  ;;  %v755_v60 = vld [vmem:[%s1508_s11 + $0x38] sm:$0xff]  ;;  %v1719_v61 = vpop.f32.mrb[10].mxu0  ;;  %v1721_v62 = vpop.f32.mrb[10].mxu1  ;;  %957 = vst.msk [vmem:[%s1508_s11 + $0x18] sm:$0xff] %vm262_vm0, %v925_v54  ;;  %v791_v2 = vmul.f32 %v1645_v53, %v752_v58  ;;  %v807_v3 = vmul.f32 %v1645_v53, %v768_v59  ;;  %v753_v5 = vld [vmem:[%s1508_s11 + $0x28] sm:$0xff]  ;;  %v321_v28 = vld [vmem:[%s1508_s11 + $0xd0] sm:$0xff] }
 0x13e   : > { %973 = vst.msk [vmem:[%s1508_s11 + $0x98] sm:$0xff] %vm262_vm0, %v941_v55  ;;  %v923_v63 = vsel %vm859_vm7, %v827_v43, %v891_v51  ;;  %v939_v0 = vsel %vm875_vm8, %v843_v44, %v907_v52  ;;  %v771_v4 = vld [vmem:[%s1508_s11 + $0xb8] sm:$0xff]  ;;  %v769_v6 = vld [vmem:[%s1508_s11 + $0xa8] sm:$0xff]  ;;  %v1732_v7 = vpop.f32.mrb[11].mxu0  ;;  %v1734_v8 = vpop.f32.mrb[11].mxu1  ;;  %v832_v9 = vadd.f32 %v1655_v1, %v793_v56  ;;  %v794_v11 = vmul.f32 %v1645_v53, %v755_v60  ;;  %v319_v30 = vld [vmem:[%s1508_s11 + $0xc0] sm:$0xff] }
 0x13f   : > { %955 = vst.msk [vmem:[%s1508_s11 + $0x8] sm:$0xff] %vm262_vm0, %v923_v63  ;;  %971 = vst.msk [vmem:[%s1508_s11 + $0x88] sm:$0xff] %vm262_vm0, %v939_v0  ;;  %v848_v10 = vadd.f32 %v1655_v1, %v809_v57  ;;  %v810_v12 = vmul.f32 %v1645_v53, %v771_v4  ;;  %v830_v13 = vadd.f32 %v1655_v1, %v791_v2  ;;  %v1748_v17 = vpop.f32.mrb[12].mxu0  ;;  %v1750_v18 = vpop.f32.mrb[12].mxu1  ;;  %v306_v37 = vld [vmem:[%s1508_s11 + $0x58] sm:$0xff]  ;;  %v304_v41 = vld [vmem:[%s1508_s11 + $0x48] sm:$0xff] }
 0x140   : > { %v846_v14 = vadd.f32 %v1655_v1, %v807_v3  ;;  %v792_v15 = vmul.f32 %v1645_v53, %v753_v5  ;;  %v808_v16 = vmul.f32 %v1645_v53, %v769_v6  ;;  %vm864_vm9 = vcmp.ge.f32.partialorder %v832_v9, 0.0  ;;  %v601_v31 = vpop.f32.mrb[13].mxu0  ;;  %v665_v32 = vpop.f32.mrb[13].mxu1  ;;  %v322_v38 = vld [vmem:[%s1508_s11 + $0xd8] sm:$0xff]  ;;  %v320_v42 = vld [vmem:[%s1508_s11 + $0xc8] sm:$0xff]  ;;  %v309_v49 = vld [vmem:[%s1508_s11 + $0x70] sm:$0xff] }
 0x141   : > { %v896_v19 = vmul.f32 0.2, %v832_v9  ;;  %vm880_vm10 = vcmp.ge.f32.partialorder %v848_v10, 0.0  ;;  %v912_v20 = vmul.f32 0.2, %v848_v10  ;;  %vm862_vm11 = vcmp.ge.f32.partialorder %v830_v13, 0.0 }
 0x142   : > { %v894_v21 = vmul.f32 0.2, %v830_v13  ;;  %vm878_vm12 = vcmp.ge.f32.partialorder %v846_v14, 0.0  ;;  %v910_v22 = vmul.f32 0.2, %v846_v14  ;;  %v833_v26 = vadd.f32 %v1655_v1, %v794_v11  ;;  %v1175_v43 = vpop.f32.mrb[14].mxu0 }
 0x143   : > { %v928_v24 = vsel %vm864_vm9, %v832_v9, %v896_v19  ;;  %v944_v25 = vsel %vm880_vm10, %v848_v10, %v912_v20  ;;  %v849_v27 = vadd.f32 %v1655_v1, %v810_v12  ;;  %v831_v35 = vadd.f32 %v1655_v1, %v792_v15  ;;  %v1191_v44 = vpop.f32.mrb[14].mxu1  ;;  %v325_v50 = vld [vmem:[%s1508_s11 + $0xf0] sm:$0xff]  ;;  %v307_v58 = vld [vmem:[%s1508_s11 + $0x60] sm:$0xff]  ;;  %v310_v60 = vld [vmem:[%s1508_s11 + $0x78] sm:$0xff]  ;;  %v604_v63 = vpop.f32.mrb[15].mxu0 }
 0x144   : > { %960 = vst.msk [vmem:[%s1508_s11 + $0x30] sm:$0xff] %vm262_vm0, %v928_v24  ;;  %976 = vst.msk [vmem:[%s1508_s11 + $0xb0] sm:$0xff] %vm262_vm0, %v944_v25  ;;  %v926_v33 = vsel %vm862_vm11, %v830_v13, %v894_v21  ;;  %v942_v34 = vsel %vm878_vm12, %v846_v14, %v910_v22  ;;  %v847_v36 = vadd.f32 %v1655_v1, %v808_v16  ;;  %vm865_vm13 = vcmp.ge.f32.partialorder %v833_v26, 0.0  ;;  %v323_v59 = vld [vmem:[%s1508_s11 + $0xe0] sm:$0xff]  ;;  %v668_v0 = vpop.f32.mrb[15].mxu1  ;;  %v326_v4 = vld [vmem:[%s1508_s11 + $0xf8] sm:$0xff] }
 0x145   : > { %958 = vst.msk [vmem:[%s1508_s11 + $0x20] sm:$0xff] %vm262_vm0, %v926_v33  ;;  %974 = vst.msk [vmem:[%s1508_s11 + $0xa0] sm:$0xff] %vm262_vm0, %v942_v34  ;;  %v897_v45 = vmul.f32 0.2, %v833_v26  ;;  %vm881_vm14 = vcmp.ge.f32.partialorder %v849_v27, 0.0  ;;  %vm863_vm15 = vcmp.ge.f32.partialorder %v831_v35, 0.0  ;;  %v690_v56 = vadd.f32 %v1694_v39, %v305_v23 }
 0x146   : > { %v913_v46 = vmul.f32 0.2, %v849_v27  ;;  %v895_v51 = vmul.f32 0.2, %v831_v35  ;;  %vm879_vm1 = vcmp.ge.f32.partialorder %v847_v36, 0.0  ;;  %v706_v57 = vadd.f32 %v1696_v40, %v321_v28  ;;  %v308_v5 = vld [vmem:[%s1508_s11 + $0x68] sm:$0xff] }
 0x147   : > { %v911_v52 = vmul.f32 0.2, %v847_v36  ;;  %v929_v54 = vsel %vm865_vm13, %v833_v26, %v897_v45  ;;  %v688_v39 = vadd.f32 %v1706_v47, %v303_v29  ;;  %v704_v40 = vadd.f32 %v1708_v48, %v319_v30  ;;  %v324_v6 = vld [vmem:[%s1508_s11 + $0xe8] sm:$0xff]  ;;  %723 = vst.msk [vmem:[%s1508_s11 + $0x50] sm:$0xff] %vm262_vm0, %v690_v56 }
 0x148   : > { %v945_v55 = vsel %vm881_vm14, %v849_v27, %v913_v46  ;;  %961 = vst.msk [vmem:[%s1508_s11 + $0x38] sm:$0xff] %vm262_vm0, %v929_v54  ;;  %v927_v2 = vsel %vm863_vm15, %v831_v35, %v895_v51  ;;  %739 = vst.msk [vmem:[%s1508_s11 + $0xd0] sm:$0xff] %vm262_vm0, %v706_v57  ;;  %v691_v9 = vadd.f32 %v1719_v61, %v306_v37 }
 0x149   : > { %977 = vst.msk [vmem:[%s1508_s11 + $0xb8] sm:$0xff] %vm262_vm0, %v945_v55  ;;  %v943_v3 = vsel %vm879_vm1, %v847_v36, %v911_v52  ;;  %959 = vst.msk [vmem:[%s1508_s11 + $0x28] sm:$0xff] %vm262_vm0, %v927_v2  ;;  %v707_v47 = vadd.f32 %v1721_v62, %v322_v38  ;;  %v689_v48 = vadd.f32 %v1732_v7, %v304_v41 }
 0x14a   : > { %975 = vst.msk [vmem:[%s1508_s11 + $0xa8] sm:$0xff] %vm262_vm0, %v943_v3  ;;  %v705_v10 = vadd.f32 %v1734_v8, %v320_v42  ;;  %721 = vst.msk [vmem:[%s1508_s11 + $0x40] sm:$0xff] %vm262_vm0, %v688_v39  ;;  %v694_v11 = vadd.f32 %v1748_v17, %v309_v49  ;;  %v710_v12 = vadd.f32 %v1750_v18, %v325_v50 }
 0x14b   : > { %737 = vst.msk [vmem:[%s1508_s11 + $0xc0] sm:$0xff] %vm262_vm0, %v704_v40  ;;  %v692_v61 = vadd.f32 %v601_v31, %v307_v58  ;;  %v708_v62 = vadd.f32 %v665_v32, %v323_v59  ;;  %724 = vst.msk [vmem:[%s1508_s11 + $0x58] sm:$0xff] %vm262_vm0, %v691_v9  ;;  %v695_v7 = vadd.f32 %v1175_v43, %v310_v60 }
 0x14c   : > { %740 = vst.msk [vmem:[%s1508_s11 + $0xd8] sm:$0xff] %vm262_vm0, %v707_v47  ;;  %722 = vst.msk [vmem:[%s1508_s11 + $0x48] sm:$0xff] %vm262_vm0, %v689_v48  ;;  %v711_v8 = vadd.f32 %v1191_v44, %v326_v4  ;;  %v693_v13 = vadd.f32 %v604_v63, %v308_v5  ;;  %v709_v14 = vadd.f32 %v668_v0, %v324_v6 }
 0x14d   : > { %738 = vst.msk [vmem:[%s1508_s11 + $0xc8] sm:$0xff] %vm262_vm0, %v705_v10  ;;  %727 = vst.msk [vmem:[%s1508_s11 + $0x70] sm:$0xff] %vm262_vm0, %v694_v11 }
 0x14e   : > { %743 = vst.msk [vmem:[%s1508_s11 + $0xf0] sm:$0xff] %vm262_vm0, %v710_v12  ;;  %725 = vst.msk [vmem:[%s1508_s11 + $0x60] sm:$0xff] %vm262_vm0, %v692_v61  ;;  %v758_v15 = vld [vmem:[%s1508_s11 + $0x50] sm:$0xff] }
 0x14f   : > { %741 = vst.msk [vmem:[%s1508_s11 + $0xe0] sm:$0xff] %vm262_vm0, %v708_v62  ;;  %728 = vst.msk [vmem:[%s1508_s11 + $0x78] sm:$0xff] %vm262_vm0, %v695_v7  ;;  %v774_v16 = vld [vmem:[%s1508_s11 + $0xd0] sm:$0xff]  ;;  %v797_v17 = vmul.f32 %v1645_v53, %v758_v15 }
 0x150   : > { %744 = vst.msk [vmem:[%s1508_s11 + $0xf8] sm:$0xff] %vm262_vm0, %v711_v8  ;;  %726 = vst.msk [vmem:[%s1508_s11 + $0x68] sm:$0xff] %vm262_vm0, %v693_v13  ;;  %v813_v18 = vmul.f32 %v1645_v53, %v774_v16 }
 0x151   : > { %742 = vst.msk [vmem:[%s1508_s11 + $0xe8] sm:$0xff] %vm262_vm0, %v709_v14  ;;  %v756_v19 = vld [vmem:[%s1508_s11 + $0x40] sm:$0xff]  ;;  %v836_v26 = vadd.f32 %v1655_v1, %v797_v17 }
 0x152   : > { %v772_v20 = vld [vmem:[%s1508_s11 + $0xc0] sm:$0xff]  ;;  %v795_v21 = vmul.f32 %v1645_v53, %v756_v19  ;;  %v759_v23 = vld [vmem:[%s1508_s11 + $0x58] sm:$0xff]  ;;  %v852_v27 = vadd.f32 %v1655_v1, %v813_v18 }
 0x153   : > { %v811_v22 = vmul.f32 %v1645_v53, %v772_v20  ;;  %v775_v24 = vld [vmem:[%s1508_s11 + $0xd8] sm:$0xff]  ;;  %v757_v25 = vld [vmem:[%s1508_s11 + $0x48] sm:$0xff]  ;;  %v798_v28 = vmul.f32 %v1645_v53, %v759_v23  ;;  %vm868_vm2 = vcmp.ge.f32.partialorder %v836_v26, 0.0  ;;  %v900_v35 = vmul.f32 0.2, %v836_v26 }
 0x154   : > { %v814_v29 = vmul.f32 %v1645_v53, %v775_v24  ;;  %v773_v30 = vld [vmem:[%s1508_s11 + $0xc8] sm:$0xff]  ;;  %v834_v31 = vadd.f32 %v1655_v1, %v795_v21  ;;  %v796_v33 = vmul.f32 %v1645_v53, %v757_v25  ;;  %vm884_vm3 = vcmp.ge.f32.partialorder %v852_v27, 0.0  ;;  %v762_v45 = vld [vmem:[%s1508_s11 + $0x70] sm:$0xff] }
 0x155   : > { %v850_v32 = vadd.f32 %v1655_v1, %v811_v22  ;;  %v812_v34 = vmul.f32 %v1645_v53, %v773_v30  ;;  %v916_v36 = vmul.f32 0.2, %v852_v27  ;;  %v932_v41 = vsel %vm868_vm2, %v836_v26, %v900_v35  ;;  %v778_v46 = vld [vmem:[%s1508_s11 + $0xf0] sm:$0xff]  ;;  %v760_v49 = vld [vmem:[%s1508_s11 + $0x60] sm:$0xff] }
 0x156   : > { %vm866_vm4 = vcmp.ge.f32.partialorder %v834_v31, 0.0  ;;  %v898_v37 = vmul.f32 0.2, %v834_v31  ;;  %v837_v43 = vadd.f32 %v1655_v1, %v798_v28  ;;  %v853_v44 = vadd.f32 %v1655_v1, %v814_v29  ;;  %964 = vst.msk [vmem:[%s1508_s11 + $0x50] sm:$0xff] %vm262_vm0, %v932_v41  ;;  %v776_v55 = vld [vmem:[%s1508_s11 + $0xe0] sm:$0xff]  ;;  %v763_v56 = vld [vmem:[%s1508_s11 + $0x78] sm:$0xff] }
 0x157   : > { %vm882_vm5 = vcmp.ge.f32.partialorder %v850_v32, 0.0  ;;  %v914_v38 = vmul.f32 0.2, %v850_v32  ;;  %v948_v42 = vsel %vm884_vm3, %v852_v27, %v916_v36  ;;  %v835_v52 = vadd.f32 %v1655_v1, %v796_v33  ;;  %v779_v57 = vld [vmem:[%s1508_s11 + $0xf8] sm:$0xff]  ;;  %v761_v40 = vld [vmem:[%s1508_s11 + $0x68] sm:$0xff] }
 0x158   : > { %980 = vst.msk [vmem:[%s1508_s11 + $0xd0] sm:$0xff] %vm262_vm0, %v948_v42  ;;  %v930_v50 = vsel %vm866_vm4, %v834_v31, %v898_v37  ;;  %v851_v54 = vadd.f32 %v1655_v1, %v812_v34  ;;  %vm869_vm6 = vcmp.ge.f32.partialorder %v837_v43, 0.0  ;;  %v901_v58 = vmul.f32 0.2, %v837_v43  ;;  %v777_v4 = vld [vmem:[%s1508_s11 + $0xe8] sm:$0xff] }
 0x159   : > { %v946_v51 = vsel %vm882_vm5, %v850_v32, %v914_v38  ;;  %962 = vst.msk [vmem:[%s1508_s11 + $0x40] sm:$0xff] %vm262_vm0, %v930_v50  ;;  %vm885_vm7 = vcmp.ge.f32.partialorder %v853_v44, 0.0  ;;  %v917_v59 = vmul.f32 0.2, %v853_v44  ;;  %vm867_vm8 = vcmp.ge.f32.partialorder %v835_v52, 0.0 }
 0x15a   : > { %978 = vst.msk [vmem:[%s1508_s11 + $0xc0] sm:$0xff] %vm262_vm0, %v946_v51  ;;  %v899_v60 = vmul.f32 0.2, %v835_v52  ;;  %vm883_vm9 = vcmp.ge.f32.partialorder %v851_v54, 0.0  ;;  %v915_v63 = vmul.f32 0.2, %v851_v54  ;;  %v933_v0 = vsel %vm869_vm6, %v837_v43, %v901_v58 }
 0x15b   : > { %v949_v2 = vsel %vm885_vm7, %v853_v44, %v917_v59  ;;  %v801_v3 = vmul.f32 %v1645_v53, %v762_v45  ;;  %v817_v39 = vmul.f32 %v1645_v53, %v778_v46  ;;  %965 = vst.msk [vmem:[%s1508_s11 + $0x58] sm:$0xff] %vm262_vm0, %v933_v0  ;;  %v799_v9 = vmul.f32 %v1645_v53, %v760_v49 }
 0x15c   : > { %981 = vst.msk [vmem:[%s1508_s11 + $0xd8] sm:$0xff] %vm262_vm0, %v949_v2  ;;  %v931_v5 = vsel %vm867_vm8, %v835_v52, %v899_v60  ;;  %v947_v6 = vsel %vm883_vm9, %v851_v54, %v915_v63  ;;  %v815_v47 = vmul.f32 %v1645_v53, %v776_v55  ;;  %v802_v11 = vmul.f32 %v1645_v53, %v763_v56 }
 0x15d   : > { %963 = vst.msk [vmem:[%s1508_s11 + $0x48] sm:$0xff] %vm262_vm0, %v931_v5  ;;  %979 = vst.msk [vmem:[%s1508_s11 + $0xc8] sm:$0xff] %vm262_vm0, %v947_v6  ;;  %v840_v48 = vadd.f32 %v1655_v1, %v801_v3  ;;  %v856_v10 = vadd.f32 %v1655_v1, %v817_v39  ;;  %v818_v12 = vmul.f32 %v1645_v53, %v779_v57 }
 0x15e   : > { %v838_v61 = vadd.f32 %v1655_v1, %v799_v9  ;;  %v854_v62 = vadd.f32 %v1655_v1, %v815_v47  ;;  %v800_v7 = vmul.f32 %v1645_v53, %v761_v40  ;;  %v816_v8 = vmul.f32 %v1645_v53, %v777_v4 }
 0x15f   : > { %vm872_vm10 = vcmp.ge.f32.partialorder %v840_v48, 0.0  ;;  %v904_v13 = vmul.f32 0.2, %v840_v48  ;;  %vm888_vm11 = vcmp.ge.f32.partialorder %v856_v10, 0.0  ;;  %v920_v14 = vmul.f32 0.2, %v856_v10 }
 0x160   : > { %vm870_vm12 = vcmp.ge.f32.partialorder %v838_v61, 0.0  ;;  %v902_v15 = vmul.f32 0.2, %v838_v61  ;;  %vm886_vm13 = vcmp.ge.f32.partialorder %v854_v62, 0.0  ;;  %v918_v16 = vmul.f32 0.2, %v854_v62 }
 0x161   : > { %v936_v17 = vsel %vm872_vm10, %v840_v48, %v904_v13  ;;  %v952_v18 = vsel %vm888_vm11, %v856_v10, %v920_v14  ;;  %v841_v19 = vadd.f32 %v1655_v1, %v802_v11  ;;  %v857_v20 = vadd.f32 %v1655_v1, %v818_v12 }
 0x162   : > { %968 = vst.msk [vmem:[%s1508_s11 + $0x70] sm:$0xff] %vm262_vm0, %v936_v17  ;;  %984 = vst.msk [vmem:[%s1508_s11 + $0xf0] sm:$0xff] %vm262_vm0, %v952_v18  ;;  %v934_v53 = vsel %vm870_vm12, %v838_v61, %v902_v15  ;;  %v950_v21 = vsel %vm886_vm13, %v854_v62, %v918_v16  ;;  %v839_v22 = vadd.f32 %v1655_v1, %v800_v7 }
 0x163   : > { %v855_v23 = vadd.f32 %v1655_v1, %v816_v8  ;;  %966 = vst.msk [vmem:[%s1508_s11 + $0x60] sm:$0xff] %vm262_vm0, %v934_v53  ;;  %982 = vst.msk [vmem:[%s1508_s11 + $0xe0] sm:$0xff] %vm262_vm0, %v950_v21  ;;  %vm873_vm14 = vcmp.ge.f32.partialorder %v841_v19, 0.0  ;;  %v905_v24 = vmul.f32 0.2, %v841_v19  ;;  %vm889_vm15 = vcmp.ge.f32.partialorder %v857_v20, 0.0 }
 0x164   : > { %v921_v25 = vmul.f32 0.2, %v857_v20  ;;  %vm871_vm1 = vcmp.ge.f32.partialorder %v839_v22, 0.0  ;;  %v903_v26 = vmul.f32 0.2, %v839_v22 }
 0x165   : > { %vm887_vm2 = vcmp.ge.f32.partialorder %v855_v23, 0.0  ;;  %v919_v27 = vmul.f32 0.2, %v855_v23  ;;  %v937_v28 = vsel %vm873_vm14, %v841_v19, %v905_v24 }
 0x166   : > { %v953_v29 = vsel %vm889_vm15, %v857_v20, %v921_v25  ;;  %969 = vst.msk [vmem:[%s1508_s11 + $0x78] sm:$0xff] %vm262_vm0, %v937_v28  ;;  %v935_v1 = vsel %vm871_vm1, %v839_v22, %v903_v26 }
 0x167   : > { %985 = vst.msk [vmem:[%s1508_s11 + $0xf8] sm:$0xff] %vm262_vm0, %v953_v29  ;;  %v951_v30 = vsel %vm887_vm2, %v855_v23, %v919_v27  ;;  %967 = vst.msk [vmem:[%s1508_s11 + $0x68] sm:$0xff] %vm262_vm0, %v935_v1 }
 0x168   : > { %983 = vst.msk [vmem:[%s1508_s11 + $0xe8] sm:$0xff] %vm262_vm0, %v951_v30 }
 0x169 PF: > { %s17_s20 = sadd.s32 1, %s1370_s20   ;;  %s1937_s15 = smov %s1354_s16 }
 0x16a   : > { %p14_p7 = scmp.ge.s32.totalorder %s17_s20, 6   ;;  %s1938_s16 = smov %s1358_s17 }
 0x16b   : > { %s1939_s17 = smov %s1450_s27  ;;  %s1940_s18 = smov %s1366_s19 }
 0x16c   : > { %s1941_s19 = smov %s1943_s22  ;;  %16 = sbr.rel (!%p14_p7) target bundleno = 4 (0x4), region = 87 }
 0x173   :  { %1008 = vsyncpa [#allocation3], 1 }
 0x174   :  { %1010 = vsyncpa [#allocation3 + $0x1], 1 }

</bundles_post_ra>
